<compile_context>
chip_gen: v7x
topology: tpu7x:2x2x1
jax: 0.10.0
libtpu: 0.0.40
codegen_flags: <defaults>
</compile_context>

<pallas_src>
import jax
import jax.numpy as jnp
from jax.experimental import pallas as pl
from jax.experimental.pallas import tpu as pltpu

IN_CH = 8                 # inchannels  (small, per instructions)
OUT_CH = 4                # outchannels
HIDDEN = 32               # hiddensize  (small stand-in for 64)
HEADS = 2                 # assumed AttnBlock heads
DIM_HEAD = 16             # assumed AttnBlock head dim
INNER = HEADS * DIM_HEAD  # 32
QKV = 3 * INNER           # 96
FUSED = HIDDEN + QKV      # 128 -> lane-dense fused first matmul
LANES = 128               # lane-dense padded output width


def _net_kernel(x_ref, wcat_ref, bcat_ref, wo_ref, bo_ref, w2p_ref, b2p_ref, o_ref):
    x = x_ref[...]                                                  # (B_TILE, IN_CH)

    # Fused Linear(inchannels->hidden) + qkv projection: one (K=8, N=128) MXU op.
    hq = jnp.dot(x, wcat_ref[...],
                 preferred_element_type=jnp.float32) + bcat_ref[...]  # (B_TILE, 128)
    h = hq[:, :HIDDEN]                                              # (B_TILE, 32)

    # Degenerate attention: identical sequence rows => uniform softmax => output == v.
    v = hq[:, HIDDEN + 2 * INNER:]                                  # (B_TILE, 32)
    h = h + jnp.dot(v, wo_ref[...],
                    preferred_element_type=jnp.float32) + bo_ref[...]

    # Linear(hidden->outchannels) padded to 128 output lanes + tanh.
    # (mean over identical sequence rows is the identity, so no reduction needed.)
    o_ref[...] = jnp.tanh(
        jnp.dot(h, w2p_ref[...], preferred_element_type=jnp.float32) + b2p_ref[...])


def init_params(key):
    """Deterministic PyTorch-Linear-style init (uniform +/- 1/sqrt(fan_in))."""
    ks = jax.random.split(key, 7)

    def lin(k, fan_in, shape):
        bound = 1.0 / (fan_in ** 0.5)
        return jax.random.uniform(k, shape, jnp.float32, -bound, bound)

    w1   = lin(ks[0], IN_CH,  (IN_CH, HIDDEN))
    b1   = lin(ks[1], IN_CH,  (1, HIDDEN))
    wqkv = lin(ks[2], HIDDEN, (HIDDEN, QKV))
    wo   = lin(ks[3], INNER,  (INNER, HIDDEN))
    bo   = lin(ks[4], INNER,  (1, HIDDEN))
    w2   = lin(ks[5], HIDDEN, (HIDDEN, OUT_CH))
    b2   = lin(ks[6], HIDDEN, (1, OUT_CH))
    return (w1, b1, wqkv, wo, bo, w2, b2)


def fuse_params(params):
    """Host-side weight prep: fuse W1|W1@Wqkv and pad the output projection to 128 lanes."""
    w1, b1, wqkv, wo, bo, w2, b2 = params
    wcat = jnp.concatenate([w1, w1 @ wqkv], axis=1)                    # (8, 128)
    bcat = jnp.concatenate([b1, b1 @ wqkv], axis=1)                    # (1, 128)
    w2p = jnp.zeros((HIDDEN, LANES), jnp.float32).at[:, :OUT_CH].set(w2)
    b2p = jnp.zeros((1, LANES), jnp.float32).at[:, :OUT_CH].set(b2)
    return (wcat, bcat, wo, bo, w2p, b2p)


def net_forward(x, fused_params, *, b_tile=256):
    if x.ndim == 1:          # mirrors the try/except unsqueeze in PyTorch forward
        x = x[None, :]
    B, C = x.shape
    assert C == IN_CH

    # Batch tiling: keep the tile modest (fits scoped VMEM even on v7x) and pad B.
    b_tile = min(b_tile, max(8, int(pl.cdiv(B, 8)) * 8))
    b_pad = int(pl.cdiv(B, b_tile)) * b_tile
    x_pad = jnp.pad(x.astype(jnp.float32), ((0, b_pad - B), (0, 0)))

    wcat, bcat, wo, bo, w2p, b2p = fused_params
    const = lambda i: (0, 0)

    out = pl.pallas_call(
        _net_kernel,
        out_shape=jax.ShapeDtypeStruct((b_pad, LANES), jnp.float32),
        grid=(b_pad // b_tile,),
        in_specs=[
            pl.BlockSpec((b_tile, IN_CH), lambda i: (i, 0)),   # activations, tiled over B
            pl.BlockSpec((IN_CH, FUSED), const),               # resident weights
            pl.BlockSpec((1, FUSED), const),
            pl.BlockSpec((INNER, HIDDEN), const),
            pl.BlockSpec((1, HIDDEN), const),
            pl.BlockSpec((HIDDEN, LANES), const),
            pl.BlockSpec((1, LANES), const),
        ],
        out_specs=pl.BlockSpec((b_tile, LANES), lambda i: (i, 0)),
        compiler_params=pltpu.CompilerParams(
            dimension_semantics=("parallel",)),
    )(x_pad, wcat, bcat, wo, bo, w2p, b2p)

    return out[:B, :OUT_CH]


def reference_forward(x, params):
    """Pure-JAX reference implementing the full (expanded) PyTorch forward."""
    w1, b1, wqkv, wo, bo, w2, b2 = params
    if x.ndim == 1:
        x = x[None, :]
    B, C = x.shape
    xe = jnp.broadcast_to(x[:, None, :], (B, C, C)).astype(jnp.float32)
    h = xe @ w1 + b1
    qkv = h @ wqkv
    scale = 1.0 / (DIM_HEAD ** 0.5)
    outs = []
    for hd in range(HEADS):
        off = hd * DIM_HEAD
        q = qkv[:, :, off:off + DIM_HEAD]
        k = qkv[:, :, INNER + off:INNER + off + DIM_HEAD]
        v = qkv[:, :, 2 * INNER + off:2 * INNER + off + DIM_HEAD]
        s = jnp.einsum('bid,bjd->bij', q, k) * scale
        p = jax.nn.softmax(s, axis=-1)
        outs.append(jnp.einsum('bij,bjd->bid', p, v))
    attn = jnp.concatenate(outs, axis=-1)
    h = h + attn @ wo + bo
    y = jnp.tanh(h @ w2 + b2)
    return jnp.mean(y, axis=1)


if __name__ == "__main__":
    key = jax.random.PRNGKey(0)
    kx, kp = jax.random.split(key)
    x = jax.random.normal(kx, (2, IN_CH), jnp.float32)   # batch=2, inchannels=8
    params = init_params(kp)
    fused = fuse_params(params)

    out = net_forward(x, fused)
    jax.block_until_ready(out)

    ref = reference_forward(x, params)
    assert out.shape == (2, OUT_CH)
    assert jnp.allclose(out, ref, atol=2e-5, rtol=2e-5), \
        float(jnp.max(jnp.abs(out - ref)))
    print("KERNEL_OK")
</pallas_src>

<mosaic_0001>
module attributes {stable_mosaic.version = 11 : i64} {
  func.func @_net_kernel(%arg0: i32, %arg1: memref<8x8xf32, #tpu.memory_space<vmem>>, %arg2: memref<8x128xf32, #tpu.memory_space<vmem>>, %arg3: memref<1x128xf32, #tpu.memory_space<vmem>>, %arg4: memref<32x32xf32, #tpu.memory_space<vmem>>, %arg5: memref<1x32xf32, #tpu.memory_space<vmem>>, %arg6: memref<32x128xf32, #tpu.memory_space<vmem>>, %arg7: memref<1x128xf32, #tpu.memory_space<vmem>>, %arg8: memref<8x128xf32, #tpu.memory_space<vmem>>) attributes {dimension_semantics = [#tpu.dimension_semantics<parallel>], iteration_bounds = array<i64: 1>, scalar_prefetch = 0 : i64, scratch_operands = 0 : i64, tpu.core_type = #tpu.core_type<tc>, window_params = [{transform_indices = @transform_0, window_bounds = array<i64: 8, 8>}, {pipeline_mode = #tpu.pipeline_mode<synchronous>, transform_indices = @transform_1, window_bounds = array<i64: 8, 128>}, {pipeline_mode = #tpu.pipeline_mode<synchronous>, transform_indices = @transform_2, window_bounds = array<i64: 1, 128>}, {pipeline_mode = #tpu.pipeline_mode<synchronous>, transform_indices = @transform_3, window_bounds = array<i64: 32, 32>}, {pipeline_mode = #tpu.pipeline_mode<synchronous>, transform_indices = @transform_4, window_bounds = array<i64: 1, 32>}, {pipeline_mode = #tpu.pipeline_mode<synchronous>, transform_indices = @transform_5, window_bounds = array<i64: 32, 128>}, {pipeline_mode = #tpu.pipeline_mode<synchronous>, transform_indices = @transform_6, window_bounds = array<i64: 1, 128>}, {transform_indices = @transform_7, window_bounds = array<i64: 8, 128>}]} {
    %c0 = arith.constant 0 : index
    %c0_0 = arith.constant 0 : index
    %0 = vector.load %arg1[%c0, %c0_0] : memref<8x8xf32, #tpu.memory_space<vmem>>, vector<8x8xf32>
    %c0_1 = arith.constant 0 : index
    %c0_2 = arith.constant 0 : index
    %1 = vector.load %arg2[%c0_1, %c0_2] : memref<8x128xf32, #tpu.memory_space<vmem>>, vector<8x128xf32>
    %cst = arith.constant dense<0.000000e+00> : vector<8x128xf32>
    %2 = tpu.matmul %0, %1, %cst {dimension_numbers = #tpu.dot_dimension_numbers<[1], [0], [0], [1], [0, 0, 1, 1], [], []>} : vector<8x8xf32>, vector<8x128xf32>, vector<8x128xf32> -> vector<8x128xf32>
    %c0_3 = arith.constant 0 : index
    %c0_4 = arith.constant 0 : index
    %3 = vector.load %arg3[%c0_3, %c0_4] : memref<1x128xf32, #tpu.memory_space<vmem>>, vector<1x128xf32>
    %4 = vector.broadcast %3 : vector<1x128xf32> to vector<8x128xf32>
    %5 = arith.addf %2, %4 : vector<8x128xf32>
    %6 = vector.extract_strided_slice %5 {offsets = [0, 0], sizes = [8, 32], strides = [1, 1]} : vector<8x128xf32> to vector<8x32xf32>
    %7 = vector.extract_strided_slice %5 {offsets = [0, 96], sizes = [8, 32], strides = [1, 1]} : vector<8x128xf32> to vector<8x32xf32>
    %c0_5 = arith.constant 0 : index
    %c0_6 = arith.constant 0 : index
    %8 = vector.load %arg4[%c0_5, %c0_6] : memref<32x32xf32, #tpu.memory_space<vmem>>, vector<32x32xf32>
    %cst_7 = arith.constant dense<0.000000e+00> : vector<8x32xf32>
    %9 = tpu.matmul %7, %8, %cst_7 {dimension_numbers = #tpu.dot_dimension_numbers<[1], [0], [0], [1], [0, 0, 1, 1], [], []>} : vector<8x32xf32>, vector<32x32xf32>, vector<8x32xf32> -> vector<8x32xf32>
    %10 = arith.addf %6, %9 : vector<8x32xf32>
    %c0_8 = arith.constant 0 : index
    %c0_9 = arith.constant 0 : index
    %11 = vector.load %arg5[%c0_8, %c0_9] : memref<1x32xf32, #tpu.memory_space<vmem>>, vector<1x32xf32>
    %12 = vector.broadcast %11 : vector<1x32xf32> to vector<8x32xf32>
    %13 = arith.addf %10, %12 : vector<8x32xf32>
    %c0_10 = arith.constant 0 : index
    %c0_11 = arith.constant 0 : index
    %14 = vector.load %arg6[%c0_10, %c0_11] : memref<32x128xf32, #tpu.memory_space<vmem>>, vector<32x128xf32>
    %cst_12 = arith.constant dense<0.000000e+00> : vector<8x128xf32>
    %15 = tpu.matmul %13, %14, %cst_12 {dimension_numbers = #tpu.dot_dimension_numbers<[1], [0], [0], [1], [0, 0, 1, 1], [], []>} : vector<8x32xf32>, vector<32x128xf32>, vector<8x128xf32> -> vector<8x128xf32>
    %c0_13 = arith.constant 0 : index
    %c0_14 = arith.constant 0 : index
    %16 = vector.load %arg7[%c0_13, %c0_14] : memref<1x128xf32, #tpu.memory_space<vmem>>, vector<1x128xf32>
    %17 = vector.broadcast %16 : vector<1x128xf32> to vector<8x128xf32>
    %18 = arith.addf %15, %17 : vector<8x128xf32>
    %19 = math.tanh %18 : vector<8x128xf32>
    %c0_15 = arith.constant 0 : index
    %c0_16 = arith.constant 0 : index
    %20 = vector.load %arg8[%c0_15, %c0_16] : memref<8x128xf32, #tpu.memory_space<vmem>>, vector<8x128xf32>
    tpu.vector_store %arg8[%c0_15, %c0_16], %19 {strides = array<i32>} : memref<8x128xf32, #tpu.memory_space<vmem>>, vector<8x128xf32>,
    return
  }
  func.func @transform_0(%arg0: i32) -> (i32, i32) {
    %c0_i32 = arith.constant 0 : i32
    %c0_i32_0 = arith.constant 0 : i32
    return %arg0, %c0_i32 : i32, i32
  }
  func.func @transform_1(%arg0: i32) -> (i32, i32) {
    %c0_i32 = arith.constant 0 : i32
    %c0_i32_0 = arith.constant 0 : i32
    %c0_i32_1 = arith.constant 0 : i32
    return %c0_i32, %c0_i32_0 : i32, i32
  }
  func.func @transform_2(%arg0: i32) -> (i32, i32) {
    %c0_i32 = arith.constant 0 : i32
    %c0_i32_0 = arith.constant 0 : i32
    %c0_i32_1 = arith.constant 0 : i32
    return %c0_i32, %c0_i32_0 : i32, i32
  }
  func.func @transform_3(%arg0: i32) -> (i32, i32) {
    %c0_i32 = arith.constant 0 : i32
    %c0_i32_0 = arith.constant 0 : i32
    %c0_i32_1 = arith.constant 0 : i32
    return %c0_i32, %c0_i32_0 : i32, i32
  }
  func.func @transform_4(%arg0: i32) -> (i32, i32) {
    %c0_i32 = arith.constant 0 : i32
    %c0_i32_0 = arith.constant 0 : i32
    %c0_i32_1 = arith.constant 0 : i32
    return %c0_i32, %c0_i32_0 : i32, i32
  }
  func.func @transform_5(%arg0: i32) -> (i32, i32) {
    %c0_i32 = arith.constant 0 : i32
    %c0_i32_0 = arith.constant 0 : i32
    %c0_i32_1 = arith.constant 0 : i32
    return %c0_i32, %c0_i32_0 : i32, i32
  }
  func.func @transform_6(%arg0: i32) -> (i32, i32) {
    %c0_i32 = arith.constant 0 : i32
    %c0_i32_0 = arith.constant 0 : i32
    %c0_i32_1 = arith.constant 0 : i32
    return %c0_i32, %c0_i32_0 : i32, i32
  }
  func.func @transform_7(%arg0: i32) -> (i32, i32) {
    %c0_i32 = arith.constant 0 : i32
    %c0_i32_0 = arith.constant 0 : i32
    return %arg0, %c0_i32 : i32, i32
  }
}

</mosaic_0001>

<bundles_post_ra>
// kernel: tpu_custom_call.1
= control target key start
LH: loop header
LB: loop body
LE: loop exit
PB: predicated region body
PF: predicated region fallthrough
CT: control target
= control target key end

     0   :  { %12 = vsyncpa [#allocation3], 0  ;;  %s661_s0 = inlined_call_operand.hbm [shape: f32[8,8], index: 0, kind: input, shape index: {}]   ;;  %s662_s1 = inlined_call_operand.hbm [shape: f32[8,128], index: 1, kind: input, shape index: {}]   ;;  %s663_s2 = inlined_call_operand.vmem [shape: f32[1,128], index: 2, kind: input, shape index: {}]   ;;  %s664_s3 = inlined_call_operand.hbm [shape: f32[32,32], index: 3, kind: input, shape index: {}]   ;;  %s665_s4 = inlined_call_operand.vmem [shape: f32[1,32], index: 4, kind: input, shape index: {}]   ;;  %s666_s5 = inlined_call_operand.hbm [shape: f32[32,128], index: 5, kind: input, shape index: {}]   ;;  %s667_s6 = inlined_call_operand.vmem [shape: f32[1,128], index: 6, kind: input, shape index: {}]   ;;  %s668_s7 = inlined_call_operand.hbm [shape: f32[8,128], index: 7, kind: output, shape index: {}]  }
   0x1   :  { %13 = vsyncpa [#allocation6], 0 }
   0x2   :  { %14 = vsyncpa [#allocation9], 0 }
   0x3   :  { %15 = vsyncpa [#allocation4], 0  ;;  %s541_s24 = smov [#allocation5]   ;;  %s542_s26 = smov [#allocation2]  }
   0x4   :  { %s32_s25 = sshll.u32 %s541_s24, 4  ;;  %s22_s27 = sshll.u32 %s542_s26, 4  ;;  %s33_s25 = int_to_ptr.vmem [resolvable:$true] %s32_s25  ;;  %s23_s27 = int_to_ptr.vmem [resolvable:$true] %s22_s27 }
   0x5   :  { %s423_s30 = scalar_lea.hbm %s662_s1, 128 }
   0x6   :  { %p424_p0 = scmp.ne.s32.totalorder %s662_s1, %s423_s30  ;;  %p427_p1 = scmp.lt.u32.totalorder %s423_s30, %s662_s1 }
   0x8   :  { %p429_p2 = pnand %p427_p1, %p424_p0 }
   0xa   :  { %432 = shalt.err (!%p429_p2)
}
   0xb   :  { %s433_s12 = scalar_lea.vmem %s33_s25, 128  ;;  %p438_p4 = scmp.lt.s32.totalorder %s33_s25, %s33_s25 }
   0xc   :  { %p434_p3 = scmp.ne.s32.totalorder %s33_s25, %s433_s12  ;;  %p439_p5 = scmp.lt.s32.totalorder %s433_s12, %s433_s12 }
   0xe   :  { %p440_p6 = por %p439_p5, %p438_p4 }
  0x10   :  { %p441_p7 = pnand %p440_p6, %p434_p3 }
  0x12   :  { %444 = shalt.err (!%p441_p7)
}
  0x13   :  { %35 = dma.hbm_to_vmem [thread:$0]  %s662_s1, 128, %s33_s25, [#allocation6]  }
  0x14   :  { %s445_s17 = scalar_lea.hbm %s661_s0, 128 }
  0x15   :  { %p446_p8 = scmp.ne.s32.totalorder %s661_s0, %s445_s17  ;;  %p449_p9 = scmp.lt.u32.totalorder %s445_s17, %s661_s0 }
  0x17   :  { %p451_p10 = pnand %p449_p9, %p446_p8 }
  0x19   :  { %454 = shalt.err (!%p451_p10)
}
  0x1a   :  { %s455_s22 = scalar_lea.vmem %s23_s27, 128  ;;  %p460_p12 = scmp.lt.s32.totalorder %s23_s27, %s23_s27 }
  0x1b   :  { %p456_p11 = scmp.ne.s32.totalorder %s23_s27, %s455_s22  ;;  %p461_p13 = scmp.lt.s32.totalorder %s455_s22, %s455_s22 }
  0x1d   :  { %p462_p0 = por %p461_p13, %p460_p12 }
  0x1f   :  { %p463_p1 = pnand %p462_p0, %p456_p11 }
  0x21   :  { %466 = shalt.err (!%p463_p1)
}
  0x22   :  { %25 = dma.hbm_to_vmem [thread:$0]  %s661_s0, 128, %s23_s27, [#allocation3]  }
  0x23   :  { %s543_s24 = smov [#allocation7]   ;;  %s467_s29 = scalar_lea.hbm %s664_s3, 512 }
  0x24   :  { %s43_s25 = sshll.u32 %s543_s24, 4  ;;  %p468_p2 = scmp.ne.s32.totalorder %s664_s3, %s467_s29  ;;  %s44_s25 = int_to_ptr.vmem [resolvable:$true] %s43_s25 }
  0x25   :  { %p471_p3 = scmp.lt.u32.totalorder %s467_s29, %s664_s3 }
  0x27   :  { %p473_p4 = pnand %p471_p3, %p468_p2 }
  0x29   :  { %476 = shalt.err (!%p473_p4)
}
  0x2a   :  { %s477_s11 = scalar_lea.vmem %s44_s25, 512  ;;  %p482_p6 = scmp.lt.s32.totalorder %s44_s25, %s44_s25 }
  0x2b   :  { %p478_p5 = scmp.ne.s32.totalorder %s44_s25, %s477_s11  ;;  %p483_p7 = scmp.lt.s32.totalorder %s477_s11, %s477_s11 }
  0x2d   :  { %p484_p8 = por %p483_p7, %p482_p6 }
  0x2f   :  { %p485_p9 = pnand %p484_p8, %p478_p5 }
  0x31   :  { %488 = shalt.err (!%p485_p9)
}
  0x32   :  { %s544_s0 = smov 128   ;;  %s545_s27 = smov 8  }
  0x33   :  { %49 = dma.hbm_to_vmem [thread:$0]  %s664_s3, 512, %s44_s25, [#allocation6], %s544_s0, %s544_s0, %s545_s27  }
  0x34   :  { %s546_s14 = smov [#allocation8]   ;;  %s489_s18 = scalar_lea.hbm %s666_s5, 512 }
  0x35   :  { %s57_s15 = sshll.u32 %s546_s14, 4  ;;  %p490_p10 = scmp.ne.s32.totalorder %s666_s5, %s489_s18  ;;  %s58_s15 = int_to_ptr.vmem [resolvable:$true] %s57_s15 }
  0x36   :  { %p493_p11 = scmp.lt.u32.totalorder %s489_s18, %s666_s5 }
  0x38   :  { %p495_p12 = pnand %p493_p11, %p490_p10 }
  0x3a   :  { %498 = shalt.err (!%p495_p12)
}
  0x3b   :  { %s499_s1 = scalar_lea.vmem %s58_s15, 512  ;;  %p504_p0 = scmp.lt.s32.totalorder %s58_s15, %s58_s15 }
  0x3c   :  { %p500_p13 = scmp.ne.s32.totalorder %s58_s15, %s499_s1  ;;  %p505_p1 = scmp.lt.s32.totalorder %s499_s1, %s499_s1 }
  0x3e   :  { %p506_p2 = por %p505_p1, %p504_p0 }
  0x40   :  { %p507_p3 = pnand %p506_p2, %p500_p13 }
  0x42   :  { %510 = shalt.err (!%p507_p3)
}
  0x43   :  { %63 = dma.hbm_to_vmem [thread:$0]  %s666_s5, 512, %s58_s15, [#allocation9], %s544_s0, %s544_s0, %s545_s27  }
  0x44   :  { %533 = dma.done.wait [#allocation3], 128  }
  0x45   :  { %534 = vsyncadd [#allocation3], 4294967168 }
  0x46   :  { %535 = dma.done.wait [#allocation6], 640  }
  0x47   :  { %536 = vsyncadd [#allocation6], 4294966656 }
  0x48   :  { %537 = dma.done.wait [#allocation9], 512  }
  0x49   :  { %538 = vsyncadd [#allocation9], 4294966784  ;;  %v547_v0 = vmov 0.0   ;;  %vm548_vm0 = vmmov 0   ;;  %vm87_vm1 = vcmask 64512   ;;  %v79_v1 = vld [vmem:[#allocation5] sm:$0xff] }
  0x4a   :  { %371 = vmatprep.subr.mxu0 %v547_v0  ;;  %373 = vmatprep.mubr.msk.f32.mxu0 %vm548_vm0, %v547_v0  ;;  %v78_v2 = vld [vmem:[#allocation2] sm:$0xff]  ;;  %v161_v3 = vld [vmem:[#allocation7] sm:$0xff]  ;;  %v162_v4 = vld [vmem:[#allocation7 + $0x8] sm:$0xff]  ;;  %v549_v6 = vmov 0.0|0.0   ;;  %s550_s25 = smov 32   ;;  %vm168_vm2 = vcmask 261120  }
  0x4b   :  { %384 = vmatprep.mubr.msk.f32.mxu1 %vm548_vm0, %v547_v0  ;;  %372 = vmatpush3.msra.mxu0 %v79_v1  ;;  %v163_v5 = vld [vmem:[#allocation7 + $0x10] sm:$0xff]  ;;  %v399_v7 = vpack.c.bf16 %v162_v4, %v161_v3  ;;  %v164_v8 = vld [vmem:[#allocation7 + $0x18] sm:$0xff]  ;;  %v250_v10 = vld [vmem:[#allocation8] sm:$0xff]  ;;  %s551_s30 = smov [#allocation10]  }
  0x4c   :  { %374 = vmatmul.mubr.msk.f32.vlgmr.msra.gmra.mrb[0].mxu0 %vm87_vm1, %v78_v2  ;;  %398 = vmatprep.subr.bf16.mxu1 %v549_v6  ;;  %v402_v9 = vpack.c.bf16 %v164_v8, %v163_v5  ;;  %v251_v11 = vld [vmem:[#allocation8 + $0x8] sm:$0xff]  ;;  %v353_v13 = vld [vmem:[%s663_s2] ss:$0 sm:$0xff]  ;;  %v253_v19 = vld [vmem:[#allocation8 + $0x18] sm:$0xff]  ;;  %s342_s8 = sshll.u32 %s551_s30, 4  ;;  %s343_s8 = int_to_ptr.vmem [resolvable:$true] %s342_s8 }
  0x4d   :  { %395 = vmatprep.mubr.msk.f32.mxu0 %vm548_vm0, %v547_v0  ;;  %404 = vmatprep.subr.bf16.mxu0 %v549_v6  ;;  %v405_v12 = vpack.c.bf16 %v251_v11, %v250_v10  ;;  %v252_v18 = vld [vmem:[#allocation8 + $0x10] sm:$0xff]  ;;  %s511_s9 = scalar_lea.vmem %s343_s8, 128  ;;  %p516_p5 = scmp.lt.s32.totalorder %s343_s8, %s343_s8 }
  0x4e   :  { %400 = vmatpush3.bf16.msra.mxu1 %v399_v7  ;;  %v408_v20 = vpack.c.bf16 %v253_v19, %v252_v18  ;;  %v356_v22 = vld [vmem:[%s665_s4] ss:$0 sm:$0xff]  ;;  %p512_p4 = scmp.ne.s32.totalorder %s343_s8, %s511_s9  ;;  %p517_p6 = scmp.lt.s32.totalorder %s511_s9, %s511_s9 }
  0x4f   :  { %401 = vmatprep.subr.bf16.mxu1 %v549_v6  ;;  %406 = vmatpush3.bf16.msra.mxu0 %v405_v12  ;;  %v357_v26 = vld [vmem:[%s667_s6] ss:$0 sm:$0xff] }
  0x50   :  { %407 = vmatprep.subr.bf16.mxu0 %v549_v6  ;;  %p518_p7 = por %p517_p6, %p516_p5 }
  0x52   :  { %403 = vmatpush3.bf16.msra.mxu1 %v402_v9  ;;  %p519_p8 = pnand %p518_p7, %p512_p4 }
  0x53   :  { %409 = vmatpush3.bf16.msra.mxu0 %v408_v20 }
 0x11f   :  { %v157_v14 = vpop.f32.mrb[0].mxu0 }
 0x120   :  { %v158_v15 = vadd.f32 %v353_v13, %v157_v14  ;;  %v375_v16 = vpop.f32.mrb[1].mxu0 }
 0x122   :  { %166 = vrot.lane.b32.xlu0 %v158_v15, %s550_s25 }
 0x194   :  { %v167_v17 = vpop.permute.xlu0 %166 }
 0x195   :  { %385 = vmatmul.mubr.msk.f32.vlgmr.msra.gmra.mrb[0].mxu1 %vm168_vm2, %v167_v17 }
 0x268   :  { %v237_v21 = vpop.f32.mrb[0].mxu1 }
 0x269   :  { %v241_v23 = vadd.f32 %v237_v21, %v158_v15  ;;  %v386_v24 = vpop.f32.mrb[1].mxu1 }
 0x26b   :  { %v249_v25 = vadd.f32 %v356_v22, %v241_v23 }
 0x26d   :  { %396 = vmatmul.mubr.msk.f32.vlgmr.msra.gmra.mrb[2].mxu0 %vm168_vm2, %v249_v25 }
 0x340   :  { %v330_v27 = vpop.f32.mrb[2].mxu0 }
 0x341   :  { %v331_v28 = vadd.f32 %v357_v26, %v330_v27  ;;  %v397_v29 = vpop.f32.mrb[3].mxu0 }
 0x343   :  { %421 = vtanh.f32 %v331_v28 }
 0x34d   :  { %v422_v30 = vpop.eup %421 }
 0x34e   :  { %335 = vst [vmem:[#allocation10] sm:$0xff] %v422_v30 }
 0x34f   :  { %522 = shalt.err (!%p519_p8)
}
 0x350   :  { %s523_s6 = scalar_lea.hbm %s668_s7, 128 }
 0x351   :  { %p524_p9 = scmp.ne.s32.totalorder %s668_s7, %s523_s6  ;;  %p527_p10 = scmp.lt.u32.totalorder %s523_s6, %s668_s7 }
 0x353   :  { %p529_p11 = pnand %p527_p10, %p524_p9 }
 0x355   :  { %532 = shalt.err (!%p529_p11)
}
 0x356   :  { %345 = dma.vmem_to_hbm [thread:$0]  %s343_s8, 128, %s668_s7, [#allocation4]  }
 0x357   :  { %539 = dma.done.wait [#allocation4], 128  }
 0x358   :  { %540 = vsyncadd [#allocation4], 4294967168 }
 0x359   :  { %349 = vsyncpa [#allocation3], 1 }
 0x35a   :  { %350 = vsyncpa [#allocation6], 1 }
 0x35b   :  { %351 = vsyncpa [#allocation9], 1 }
 0x35c   :  { %352 = vsyncpa [#allocation4], 1 }

</bundles_post_ra>
